<compile_context>
chip_gen: v7x
topology: tpu7x:2x2x1
jax: 0.10.0
libtpu: 0.0.40
codegen_flags: <defaults>
</compile_context>

<pallas_src>
import jax
import jax.numpy as jnp
from jax import lax
from jax.experimental import pallas as pl
from jax.experimental.pallas import tpu as pltpu


def _linear_sigmoid_kernel(x_ref, w_ref, b_ref, o_ref, acc_ref):
    """One (tm, tn) output tile, accumulated over the K grid axis.

    x_ref: (tm, tk)   w_ref: (tn, tk)  [PyTorch layout, contract on last dim]
    b_ref: (1, tn)    o_ref: (tm, tn)  acc_ref: (tm, tn) f32 scratch
    """
    k = pl.program_id(2)

    @pl.when(k == 0)
    def _():
        acc_ref[...] = jnp.zeros_like(acc_ref)

    # MXU matmul: x @ W.T without materializing W.T (contract dim 1 of both).
    acc_ref[...] += lax.dot_general(
        x_ref[...], w_ref[...],
        dimension_numbers=(((1,), (1,)), ((), ())),
        preferred_element_type=jnp.float32,
    )

    # Bias add (VPU) + sigmoid (EUP) only on the final K step — off the hot loop.
    @pl.when(k == pl.num_programs(2) - 1)
    def _():
        y = acc_ref[...] + b_ref[...].astype(jnp.float32)
        o_ref[...] = jax.nn.sigmoid(y).astype(o_ref.dtype)


def _round_up(v, m):
    return (v + m - 1) // m * m


def attention_model_forward(x, weight, bias, *, tm=None, tn=None, tk=None):
    """x: [B, in_size]; weight: [out_size, in_size] (PyTorch layout); bias: [out_size].
    Returns sigmoid(x @ weight.T + bias), shape [B, out_size], dtype = x.dtype."""
    B, K = x.shape
    N = weight.shape[0]
    out_dtype = x.dtype

    # Tile sizes: tm multiple of 8 (sublane), tn/tk multiples of 128 (lane).
    # Caps chosen to fit v7x's tighter VMEM with double-buffered inputs.
    tm = tm if tm is not None else min(_round_up(B, 8), 256)
    tn = tn if tn is not None else min(_round_up(N, 128), 256)
    tk = tk if tk is not None else min(_round_up(K, 128), 512)

    Mp, Kp, Np = _round_up(B, tm), _round_up(K, tk), _round_up(N, tn)

    # Zero-pad only when needed (no-op copies are elided for aligned shapes).
    xp = x if (Mp == B and Kp == K) else jnp.pad(x, ((0, Mp - B), (0, Kp - K)))
    wp = weight if (Np == N and Kp == K) else jnp.pad(weight, ((0, Np - N), (0, Kp - K)))
    bp = (bias if Np == N else jnp.pad(bias, (0, Np - N))).reshape(1, Np)

    grid = (Mp // tm, Np // tn, Kp // tk)

    cost = pl.CostEstimate(
        flops=2 * Mp * Kp * Np,
        transcendentals=Mp * Np,
        bytes_accessed=(Mp * Kp + Np * Kp + Np + Mp * Np) * jnp.dtype(out_dtype).itemsize,
    )

    out = pl.pallas_call(
        _linear_sigmoid_kernel,
        out_shape=jax.ShapeDtypeStruct((Mp, Np), out_dtype),
        grid_spec=pltpu.PrefetchScalarGridSpec(
            num_scalar_prefetch=0,
            grid=grid,
            in_specs=[
                pl.BlockSpec((tm, tk), lambda i, j, k: (i, k)),  # x tile
                pl.BlockSpec((tn, tk), lambda i, j, k: (j, k)),  # W tile (PyTorch layout)
                pl.BlockSpec((1, tn), lambda i, j, k: (0, j)),   # bias: resident over K
            ],
            out_specs=pl.BlockSpec((tm, tn), lambda i, j, k: (i, j)),
            scratch_shapes=[pltpu.VMEM((tm, tn), jnp.float32)],
        ),
        compiler_params=pltpu.CompilerParams(
            dimension_semantics=("parallel", "parallel", "arbitrary"),
        ),
        cost_estimate=cost,
    )(xp, wp, bp)

    if Mp != B or Np != N:
        out = out[:B, :N]
    return out


if __name__ == "__main__":
    key = jax.random.PRNGKey(0)

    def make_inputs(k, batch, in_size, out_size):
        kx, kw, kb = jax.random.split(k, 3)
        x = jax.random.normal(kx, (batch, in_size), dtype=jnp.float32)
        bound = 1.0 / jnp.sqrt(jnp.float32(in_size))
        w = jax.random.uniform(kw, (out_size, in_size),
                               minval=-bound, maxval=bound, dtype=jnp.float32)
        b = jax.random.uniform(kb, (out_size,),
                               minval=-bound, maxval=bound, dtype=jnp.float32)
        return x, w, b

    # Case 1: tiny shapes matching the module's toy usage (single-tile path).
    x, w, b = make_inputs(key, batch=8, in_size=32, out_size=16)
    out = jax.block_until_ready(attention_model_forward(x, w, b))
    ref = jax.nn.sigmoid(x @ w.T + b)
    assert out.shape == (8, 16)
    assert out.dtype == x.dtype
    assert jnp.allclose(out, ref, atol=1e-5, rtol=1e-5)

    # Case 2: small multi-tile shapes to exercise the M/N/K grid + accumulator.
    k2 = jax.random.PRNGKey(1)
    x2, w2, b2 = make_inputs(k2, batch=64, in_size=256, out_size=256)
    out2 = jax.block_until_ready(
        attention_model_forward(x2, w2, b2, tm=32, tn=128, tk=128))  # grid (2, 2, 2)
    ref2 = jax.nn.sigmoid(x2 @ w2.T + b2)
    assert out2.shape == (64, 256)
    assert jnp.allclose(out2, ref2, atol=1e-5, rtol=1e-5)

    print("KERNEL_OK")
</pallas_src>

<mosaic_0001>
module attributes {stable_mosaic.version = 11 : i64} {
  func.func @_linear_sigmoid_kernel(%arg0: i32, %arg1: i32, %arg2: i32, %arg3: memref<8x128xf32, #tpu.memory_space<vmem>>, %arg4: memref<128x128xf32, #tpu.memory_space<vmem>>, %arg5: memref<1x128xf32, #tpu.memory_space<vmem>>, %arg6: memref<8x128xf32, #tpu.memory_space<vmem>>, %arg7: memref<8x128xf32, #tpu.memory_space<vmem>>) attributes {dimension_semantics = [#tpu.dimension_semantics<parallel>, #tpu.dimension_semantics<parallel>, #tpu.dimension_semantics<arbitrary>], iteration_bounds = array<i64: 1, 1, 1>, scalar_prefetch = 0 : i64, scratch_operands = 1 : i64, tpu.core_type = #tpu.core_type<tc>, window_params = [{transform_indices = @transform_0, window_bounds = array<i64: 8, 128>}, {transform_indices = @transform_1, window_bounds = array<i64: 128, 128>}, {transform_indices = @transform_2, window_bounds = array<i64: 1, 128>}, {transform_indices = @transform_3, window_bounds = array<i64: 8, 128>}]} {
    %c0_i32 = arith.constant 0 : i32
    %0 = arith.cmpi eq, %arg2, %c0_i32 : i32
    %1 = arith.extui %0 : i1 to i32
    %c0_i32_0 = arith.constant 0 : i32
    %2 = arith.cmpi ne, %1, %c0_i32_0 : i32
    scf.if %2 {
      %cst_10 = arith.constant 0.000000e+00 : f32
      %12 = vector.broadcast %cst_10 : f32 to vector<8x128xf32>
      %c0_11 = arith.constant 0 : index
      %c0_12 = arith.constant 0 : index
      %13 = vector.load %arg7[%c0_11, %c0_12] : memref<8x128xf32, #tpu.memory_space<vmem>>, vector<8x128xf32>
      tpu.vector_store %arg7[%c0_11, %c0_12], %12 {strides = array<i32>} : memref<8x128xf32, #tpu.memory_space<vmem>>, vector<8x128xf32>,
    } else {
    }
    %c0 = arith.constant 0 : index
    %c0_1 = arith.constant 0 : index
    %3 = vector.load %arg7[%c0, %c0_1] : memref<8x128xf32, #tpu.memory_space<vmem>>, vector<8x128xf32>
    %c0_2 = arith.constant 0 : index
    %c0_3 = arith.constant 0 : index
    %4 = vector.load %arg3[%c0_2, %c0_3] : memref<8x128xf32, #tpu.memory_space<vmem>>, vector<8x128xf32>
    %c0_4 = arith.constant 0 : index
    %c0_5 = arith.constant 0 : index
    %5 = vector.load %arg4[%c0_4, %c0_5] : memref<128x128xf32, #tpu.memory_space<vmem>>, vector<128x128xf32>
    %cst = arith.constant dense<0.000000e+00> : vector<8x128xf32>
    %6 = tpu.matmul %4, %5, %cst {dimension_numbers = #tpu.dot_dimension_numbers<[1], [1], [0], [0], [0, 0, 1, 0], [], []>} : vector<8x128xf32>, vector<128x128xf32>, vector<8x128xf32> -> vector<8x128xf32>
    %7 = arith.addf %3, %6 : vector<8x128xf32>
    %c0_6 = arith.constant 0 : index
    %c0_7 = arith.constant 0 : index
    %8 = vector.load %arg7[%c0_6, %c0_7] : memref<8x128xf32, #tpu.memory_space<vmem>>, vector<8x128xf32>
    tpu.vector_store %arg7[%c0_6, %c0_7], %7 {strides = array<i32>} : memref<8x128xf32, #tpu.memory_space<vmem>>, vector<8x128xf32>,
    %c0_i32_8 = arith.constant 0 : i32
    %9 = arith.cmpi eq, %arg2, %c0_i32_8 : i32
    %10 = arith.extui %9 : i1 to i32
    %c0_i32_9 = arith.constant 0 : i32
    %11 = arith.cmpi ne, %10, %c0_i32_9 : i32
    scf.if %11 {
      %c0_10 = arith.constant 0 : index
      %c0_11 = arith.constant 0 : index
      %12 = vector.load %arg7[%c0_10, %c0_11] : memref<8x128xf32, #tpu.memory_space<vmem>>, vector<8x128xf32>
      %c0_12 = arith.constant 0 : index
      %c0_13 = arith.constant 0 : index
      %13 = vector.load %arg5[%c0_12, %c0_13] : memref<1x128xf32, #tpu.memory_space<vmem>>, vector<1x128xf32>
      %14 = vector.broadcast %13 : vector<1x128xf32> to vector<8x128xf32>
      %15 = arith.addf %12, %14 : vector<8x128xf32>
      %16 = arith.negf %15 : vector<8x128xf32>
      %17 = math.exp %16 : vector<8x128xf32>
      %cst_14 = arith.constant 1.000000e+00 : f32
      %18 = vector.broadcast %cst_14 : f32 to vector<8x128xf32>
      %19 = arith.addf %18, %17 : vector<8x128xf32>
      %20 = arith.divf %18, %19 : vector<8x128xf32>
      %c0_15 = arith.constant 0 : index
      %c0_16 = arith.constant 0 : index
      %21 = vector.load %arg6[%c0_15, %c0_16] : memref<8x128xf32, #tpu.memory_space<vmem>>, vector<8x128xf32>
      tpu.vector_store %arg6[%c0_15, %c0_16], %20 {strides = array<i32>} : memref<8x128xf32, #tpu.memory_space<vmem>>, vector<8x128xf32>,
    } else {
    }
    return
  }
  func.func @transform_0(%arg0: i32, %arg1: i32, %arg2: i32) -> (i32, i32) {
    %c0_i32 = arith.constant 0 : i32
    return %arg0, %arg2 : i32, i32
  }
  func.func @transform_1(%arg0: i32, %arg1: i32, %arg2: i32) -> (i32, i32) {
    %c0_i32 = arith.constant 0 : i32
    return %arg1, %arg2 : i32, i32
  }
  func.func @transform_2(%arg0: i32, %arg1: i32, %arg2: i32) -> (i32, i32) {
    %c0_i32 = arith.constant 0 : i32
    %c0_i32_0 = arith.constant 0 : i32
    return %c0_i32, %arg1 : i32, i32
  }
  func.func @transform_3(%arg0: i32, %arg1: i32, %arg2: i32) -> (i32, i32) {
    %c0_i32 = arith.constant 0 : i32
    return %arg0, %arg1 : i32, i32
  }
}

</mosaic_0001>

<bundles_post_ra>
// kernel: tpu_custom_call.1
= control target key start
LH: loop header
LB: loop body
LE: loop exit
PB: predicated region body
PF: predicated region fallthrough
CT: control target
= control target key end

     0   :  { %8 = vsyncpa [#allocation4], 0  ;;  %s407_s0 = inlined_call_operand.hbm [shape: f32[8,128], index: 0, kind: input, shape index: {}]   ;;  %s408_s1 = inlined_call_operand.hbm [shape: f32[128,128], index: 1, kind: input, shape index: {}]   ;;  %s409_s2 = inlined_call_operand.vmem [shape: f32[1,128], index: 2, kind: input, shape index: {}]   ;;  %s410_s3 = inlined_call_operand.hbm [shape: f32[8,128], index: 3, kind: output, shape index: {}]  }
   0x1   :  { %9 = vsyncpa [#allocation7], 0 }
   0x2   :  { %10 = vsyncpa [#allocation5], 0  ;;  %s333_s12 = smov [#allocation3]   ;;  %s334_s14 = smov [#allocation6]  }
   0x3   :  { %s17_s13 = sshll.u32 %s333_s12, 4  ;;  %s26_s15 = sshll.u32 %s334_s14, 4  ;;  %s18_s13 = int_to_ptr.vmem [resolvable:$true] %s17_s13  ;;  %s361_s15 = int_to_ptr.vmem [resolvable:$true] %s26_s15 }
   0x4   :  { %s261_s18 = scalar_lea.hbm %s407_s0, 128 }
   0x5   :  { %p262_p0 = scmp.ne.s32.totalorder %s407_s0, %s261_s18  ;;  %p265_p1 = scmp.lt.u32.totalorder %s261_s18, %s407_s0 }
   0x7   :  { %p267_p2 = pnand %p265_p1, %p262_p0 }
   0x9   :  { %270 = shalt.err (!%p267_p2)
}
   0xa   :  { %s271_s23 = scalar_lea.vmem %s18_s13, 128  ;;  %p276_p4 = scmp.lt.s32.totalorder %s18_s13, %s18_s13 }
   0xb   :  { %p272_p3 = scmp.ne.s32.totalorder %s18_s13, %s271_s23  ;;  %p277_p5 = scmp.lt.s32.totalorder %s271_s23, %s271_s23 }
   0xd   :  { %p278_p6 = por %p277_p5, %p276_p4 }
   0xf   :  { %p279_p7 = pnand %p278_p6, %p272_p3 }
  0x11   :  { %282 = shalt.err (!%p279_p7)
}
  0x12   :  { %20 = dma.hbm_to_vmem [thread:$0]  %s407_s0, 128, %s18_s13, [#allocation4]  }
  0x13   :  { %s283_s28 = scalar_lea.hbm %s408_s1, 2048 }
  0x14   :  { %p284_p8 = scmp.ne.s32.totalorder %s408_s1, %s283_s28  ;;  %p287_p9 = scmp.lt.u32.totalorder %s283_s28, %s408_s1 }
  0x16   :  { %p289_p10 = pnand %p287_p9, %p284_p8 }
  0x18   :  { %292 = shalt.err (!%p289_p10)
}
  0x19   :  { %s293_s6 = scalar_lea.vmem %s361_s15, 2048  ;;  %p298_p12 = scmp.lt.s32.totalorder %s361_s15, %s361_s15 }
  0x1a   :  { %p294_p11 = scmp.ne.s32.totalorder %s361_s15, %s293_s6  ;;  %p299_p13 = scmp.lt.s32.totalorder %s293_s6, %s293_s6 }
  0x1c   :  { %p300_p0 = por %p299_p13, %p298_p12 }
  0x1e   :  { %p301_p1 = pnand %p300_p0, %p294_p11 }
  0x20   :  { %304 = shalt.err (!%p301_p1)
}
  0x21   :  { %s335_s0 = smov 128   ;;  %s336_s7 = smov 8  }
  0x22   :  { %32 = dma.hbm_to_vmem [thread:$0]  %s408_s1, 2048, %s361_s15, [#allocation7], %s335_s0, %s335_s0, %s336_s7  }
  0x23   :  { %327 = dma.done.wait [#allocation4], 128  }
  0x24   :  { %328 = vsyncadd [#allocation4], 4294967168 }
  0x25   :  { %329 = dma.done.wait [#allocation7], 2048  }
  0x26   :  { %330 = vsyncadd [#allocation7], 4294965248  ;;  %v337_v0 = vmov 0.0|0.0   ;;  %vm338_vm0 = vmmov 0   ;;  %v339_v1 = vmov 0.0   ;;  %v48_v2 = vld [vmem:[#allocation6] sm:$0xff] }
  0x27   :  { %225 = vmatprep.subr.bf16.mxu0 %v337_v0  ;;  %222 = vmatprep.mubr.msk.f32.mxu0 %vm338_vm0, %v339_v1  ;;  %v49_v3 = vld [vmem:[#allocation6 + $0x8] sm:$0xff]  ;;  %v50_v5 = vld [vmem:[#allocation6 + $0x10] sm:$0xff]  ;;  %v51_v6 = vld [vmem:[#allocation6 + $0x18] sm:$0xff]  ;;  %s340_s11 = smov [#allocation8]  }
  0x28   :  { %v226_v4 = vpack.c.bf16 %v49_v3, %v48_v2  ;;  %v229_v7 = vpack.c.bf16 %v51_v6, %v50_v5  ;;  %v52_v8 = vld [vmem:[#allocation6 + $0x20] sm:$0xff]  ;;  %v53_v9 = vld [vmem:[#allocation6 + $0x28] sm:$0xff]  ;;  %v54_v11 = vld [vmem:[#allocation6 + $0x30] sm:$0xff]  ;;  %s161_s12 = sshll.u32 %s340_s11, 4  ;;  %s162_s12 = int_to_ptr.vmem [resolvable:$true] %s161_s12 }
  0x29   :  { %v232_v10 = vpack.c.bf16 %v53_v9, %v52_v8  ;;  %v55_v12 = vld [vmem:[#allocation6 + $0x38] sm:$0xff]  ;;  %v56_v14 = vld [vmem:[#allocation6 + $0x40] sm:$0xff]  ;;  %v57_v15 = vld [vmem:[#allocation6 + $0x48] sm:$0xff]  ;;  %s305_s13 = scalar_lea.vmem %s162_s12, 128  ;;  %p310_p3 = scmp.lt.s32.totalorder %s162_s12, %s162_s12 }
  0x2a   :  { %227 = vmatpush3.bf16.xpose.msra.mxu0 %v226_v4  ;;  %v235_v13 = vpack.c.bf16 %v55_v12, %v54_v11  ;;  %v238_v16 = vpack.c.bf16 %v57_v15, %v56_v14  ;;  %v58_v17 = vld [vmem:[#allocation6 + $0x50] sm:$0xff]  ;;  %v59_v18 = vld [vmem:[#allocation6 + $0x58] sm:$0xff]  ;;  %v60_v20 = vld [vmem:[#allocation6 + $0x60] sm:$0xff]  ;;  %p306_p2 = scmp.ne.s32.totalorder %s162_s12, %s305_s13  ;;  %p311_p4 = scmp.lt.s32.totalorder %s305_s13, %s305_s13 }
  0x2b   :  { %228 = vmatprep.subr.bf16.mxu0 %v337_v0  ;;  %v241_v19 = vpack.c.bf16 %v59_v18, %v58_v17  ;;  %v61_v21 = vld [vmem:[#allocation6 + $0x68] sm:$0xff]  ;;  %v62_v23 = vld [vmem:[#allocation6 + $0x70] sm:$0xff]  ;;  %v63_v24 = vld [vmem:[#allocation6 + $0x78] sm:$0xff] }
  0x2c   :  { %v244_v22 = vpack.c.bf16 %v61_v21, %v60_v20  ;;  %v247_v25 = vpack.c.bf16 %v63_v24, %v62_v23  ;;  %v47_v26 = vld [vmem:[#allocation3] sm:$0xff]  ;;  %p312_p5 = por %p311_p4, %p310_p3 }
  0x2d   :  { %v171_v27 = vld [vmem:[%s409_s2] ss:$0 sm:$0xff] }
  0x2e   :  { %p313_p6 = pnand %p312_p5, %p306_p2 }
  0x32   :  { %230 = vmatpush3.bf16.xpose.msra.mxu0 %v229_v7 }
  0x33   :  { %231 = vmatprep.subr.bf16.mxu0 %v337_v0 }
  0x3a   :  { %233 = vmatpush3.bf16.xpose.msra.mxu0 %v232_v10 }
  0x3b   :  { %234 = vmatprep.subr.bf16.mxu0 %v337_v0 }
  0x42   :  { %236 = vmatpush3.bf16.xpose.msra.mxu0 %v235_v13 }
  0x43   :  { %237 = vmatprep.subr.bf16.mxu0 %v337_v0 }
  0x4a   :  { %239 = vmatpush3.bf16.xpose.msra.mxu0 %v238_v16 }
  0x4b   :  { %240 = vmatprep.subr.bf16.mxu0 %v337_v0 }
  0x52   :  { %242 = vmatpush3.bf16.xpose.msra.mxu0 %v241_v19 }
  0x53   :  { %243 = vmatprep.subr.bf16.mxu0 %v337_v0 }
  0x5a   :  { %245 = vmatpush3.bf16.xpose.msra.mxu0 %v244_v22 }
  0x5b   :  { %246 = vmatprep.subr.bf16.mxu0 %v337_v0 }
  0x62   :  { %248 = vmatpush3.bf16.xpose.msra.mxu0 %v247_v25 }
  0x69   :  { %223 = vmatmul.mubr.f32.vlgmr.msra.gmra.mrb[0].mxu0 %v47_v26 }
 0x13c   :  { %v130_v28 = vpop.f32.mrb[0].mxu0 }
 0x13d   :  { %v147_v29 = vadd.f32 %v171_v27, %v130_v28  ;;  %v224_v30 = vpop.f32.mrb[1].mxu0 }
 0x13f   :  { %v172_v31 = vmul.f32 -1.442695, %v147_v29 }
 0x141   :  { %257 = vpow2.f32 %v172_v31 }
 0x14b   :  { %v258_v32 = vpop.eup %257 }
 0x14c   :  { %v151_v33 = vadd.f32 1.0, %v258_v32 }
 0x14e   :  { %259 = vrcp.f32 %v151_v33 }
 0x158   :  { %v260_v34 = vpop.eup %259 }
 0x159   :  { %154 = vst [vmem:[#allocation8] sm:$0xff] %v260_v34 }
 0x15a   :  { %316 = shalt.err (!%p313_p6)
}
 0x15b   :  { %s317_s15 = scalar_lea.hbm %s410_s3, 128 }
 0x15c   :  { %p318_p7 = scmp.ne.s32.totalorder %s410_s3, %s317_s15  ;;  %p321_p8 = scmp.lt.u32.totalorder %s317_s15, %s410_s3 }
 0x15e   :  { %p323_p9 = pnand %p321_p8, %p318_p7 }
 0x160   :  { %326 = shalt.err (!%p323_p9)
}
 0x161   :  { %164 = dma.vmem_to_hbm [thread:$0]  %s162_s12, 128, %s410_s3, [#allocation5]  }
 0x162   :  { %331 = dma.done.wait [#allocation5], 128  }
 0x163   :  { %332 = vsyncadd [#allocation5], 4294967168 }
 0x164   :  { %168 = vsyncpa [#allocation4], 1 }
 0x165   :  { %169 = vsyncpa [#allocation7], 1 }
 0x166   :  { %170 = vsyncpa [#allocation5], 1 }

</bundles_post_ra>
